<compile_context>
chip_gen: v6e
topology: v6e:2x2x1
jax: 0.10.0
libtpu: 0.0.40
codegen_flags: <defaults>
</compile_context>

<pallas_src>
import math
import functools

import jax
import jax.numpy as jnp
from jax.experimental import pallas as pl
from jax.experimental.pallas import tpu as pltpu


# ----------------------------- config (small, synthetic) -----------------------------
BATCH = 2
SEQ = 8
HIDDEN = 32
NUM_HEADS = 4
NUM_KV_HEADS = 2
HEAD_DIM = HIDDEN // NUM_HEADS          # 8  (real Qwen2: 128)
KV_GROUPS = NUM_HEADS // NUM_KV_HEADS   # 2
ROPE_THETA = 10000.0
DTYPE = jnp.float32

# MXU operand dtype.  Production: jnp.bfloat16 (bf16-in / fp32-accumulate on every
# generation; v7x's MXU has no int path).  Test keeps fp32 for a tight check.
MXU_DTYPE = jnp.float32


def _vmem_limit_bytes():
    """Per-generation scoped VMEM budget."""
    try:
        phys = int(pltpu.get_tpu_info().vmem_capacity_bytes)
        return int(max(32 * 1024 * 1024, min(96 * 1024 * 1024, (phys * 3) // 4)))
    except Exception:
        return 32 * 1024 * 1024


VMEM_LIMIT_BYTES = _vmem_limit_bytes()

# Tile targets (production dims divide these; the tiny test shapes fall back to full
# dims, which keeps blocks legal under the (8,128) rule).
ATTN_TQ_TARGET = 256
ATTN_TK_TARGET = 512
ROPE_TS_TARGET = 512
MM_TM_TARGET = 256
MM_TN_TARGET = 1024
MM_TK_TARGET = 1024


def _fit(dim, target):
    """Largest divisor tile of `dim` <= target (power-of-two backoff), else full dim."""
    if dim <= target:
        return dim
    t = target
    while t > 8 and dim % t:
        t //= 2
    return t if dim % t == 0 else dim


# ----------------------------- tiled matmul kernels ----------------------------------
def _matmul_kernel(x_ref, w_ref, o_ref):
    @pl.when(pl.program_id(2) == 0)
    def _():
        o_ref[...] = jnp.zeros(o_ref.shape, dtype=o_ref.dtype)

    o_ref[...] += jnp.dot(x_ref[...], w_ref[...], preferred_element_type=jnp.float32)


def _matmul_bias_kernel(x_ref, w_ref, b_ref, o_ref):
    @pl.when(pl.program_id(2) == 0)
    def _():
        # Bias is the k==0 initializer: no extra epilogue pass, no fp32 scratch.
        o_ref[...] = jnp.broadcast_to(b_ref[...].astype(o_ref.dtype), o_ref.shape)

    o_ref[...] += jnp.dot(x_ref[...], w_ref[...], preferred_element_type=jnp.float32)


def pallas_matmul(x, w, b=None, *, tm_target=MM_TM_TARGET, tn_target=MM_TN_TARGET,
                  tk_target=MM_TK_TARGET):
    """x:(M,K) @ w:(K,N) [+ b:(N,)] -> (M,N) fp32, accumulated directly in the
    resident output block (no VMEM scratch)."""
    M, K = x.shape
    K2, N = w.shape
    assert K == K2
    x = x.astype(MXU_DTYPE)
    w = w.astype(MXU_DTYPE)
    tm, tn, tk = _fit(M, tm_target), _fit(N, tn_target), _fit(K, tk_target)
    grid = (M // tm, N // tn, K // tk)

    in_specs = [
        pl.BlockSpec((tm, tk), lambda i, j, k: (i, k)),
        pl.BlockSpec((tk, tn), lambda i, j, k: (k, j)),
    ]
    if b is None:
        kernel = _matmul_kernel
        inputs = (x, w)
        extra_bytes = 0
    else:
        kernel = _matmul_bias_kernel
        in_specs.append(pl.BlockSpec((1, tn), lambda i, j, k: (0, j)))
        inputs = (x, w, b.astype(jnp.float32).reshape(1, N))
        extra_bytes = int(N * 4)

    return pl.pallas_call(
        kernel,
        out_shape=jax.ShapeDtypeStruct((M, N), jnp.float32),
        grid_spec=pltpu.PrefetchScalarGridSpec(
            num_scalar_prefetch=0,
            grid=grid,
            in_specs=in_specs,
            out_specs=pl.BlockSpec((tm, tn), lambda i, j, k: (i, j)),
        ),
        compiler_params=pltpu.CompilerParams(
            dimension_semantics=("parallel", "parallel", "arbitrary"),
            vmem_limit_bytes=VMEM_LIMIT_BYTES,
        ),
        cost_estimate=pl.CostEstimate(
            flops=int(2 * M * N * K),
            transcendentals=0,
            bytes_accessed=int((M * K + K * N) * x.dtype.itemsize + M * N * 4
                               + extra_bytes),
        ),
    )(*inputs)


# ----------------------------- RoPE pre-application kernel ---------------------------
def _rotate_half(x):
    d = x.shape[-1]
    if d % 128 == 0:
        # Lane-aligned head_dim (real Qwen2: 128): XLU roll + sign flip.
        sign = jnp.where(
            jax.lax.broadcasted_iota(jnp.int32, x.shape, x.ndim - 1) < d // 2,
            -1.0, 1.0).astype(x.dtype)
        return pltpu.roll(x, d // 2, axis=-1) * sign
    # Tiny test head_dim: slice + concat fallback.
    return jnp.concatenate([-x[..., d // 2:], x[..., : d // 2]], axis=-1)


def _rope_kernel(cos_ref, sin_ref, x_ref, o_ref, *, scale):
    x = x_ref[...].astype(jnp.float32)
    r = x * cos_ref[...] + _rotate_half(x) * sin_ref[...]
    if scale != 1.0:
        r = r * scale
    o_ref[...] = r.astype(o_ref.dtype)


def pallas_rope(x, cos, sin, *, scale=1.0, ts_target=ROPE_TS_TARGET):
    """Apply rotary embedding (and optional folded softmax scale) to x: (B, nh, S, D)."""
    B, nh, S, D = x.shape
    ts = _fit(S, ts_target)
    kernel = functools.partial(_rope_kernel, scale=scale)
    return pl.pallas_call(
        kernel,
        out_shape=jax.ShapeDtypeStruct((B, nh, S, D), MXU_DTYPE),
        grid_spec=pltpu.PrefetchScalarGridSpec(
            num_scalar_prefetch=0,
            grid=(B, nh, S // ts),
            in_specs=[
                pl.BlockSpec((ts, D), lambda b, h, si: (si, 0)),                 # cos
                pl.BlockSpec((ts, D), lambda b, h, si: (si, 0)),                 # sin
                pl.BlockSpec((None, None, ts, D), lambda b, h, si: (b, h, si, 0)),
            ],
            out_specs=pl.BlockSpec((None, None, ts, D),
                                   lambda b, h, si: (b, h, si, 0)),
        ),
        compiler_params=pltpu.CompilerParams(
            dimension_semantics=("parallel", "parallel", "parallel"),
            vmem_limit_bytes=VMEM_LIMIT_BYTES,
        ),
        cost_estimate=pl.CostEstimate(
            flops=int(4 * x.size),
            transcendentals=0,
            bytes_accessed=int(x.size * x.dtype.itemsize
                               + x.size * jnp.dtype(MXU_DTYPE).itemsize
                               + 2 * cos.size * 4),
        ),
    )(cos, sin, x)


# ----------------------- causal flash attention (compacted grid) ---------------------
def _flash_attn_kernel(qi_map_ref, ki_map_ref, q_ref, k_ref, v_ref, o_ref,
                       m_ref, l_ref, acc_ref, *, tq, tk, groups, head_dim, nk):
    p = pl.program_id(2)
    qi = qi_map_ref[p]
    ki = ki_map_ref[p]
    neg_big = jnp.finfo(jnp.float32).min

    @pl.when(ki == 0)
    def _init():
        m_ref[...] = jnp.full(m_ref.shape, -jnp.inf, dtype=jnp.float32)
        l_ref[...] = jnp.zeros(l_ref.shape, dtype=jnp.float32)
        acc_ref[...] = jnp.zeros(acc_ref.shape, dtype=jnp.float32)

    # Stacked GQA QK^T: one (G*tq, D) x (tk, D) MXU pass; the reshape is a free
    # leading-dim collapse (tq is a multiple of 8).  RoPE + 1/sqrt(D) are pre-applied.
    q = q_ref[...].reshape(groups * tq, head_dim)
    k = k_ref[...]
    v = v_ref[...]
    s = jax.lax.dot_general(q, k, (((1,), (1,)), ((), ())),
                            preferred_element_type=jnp.float32)        # (G*tq, tk)

    def _online_softmax_update(scores):
        m_prev = m_ref[...]
        m_new = jnp.maximum(m_prev, jnp.max(scores, axis=-1, keepdims=True))
        alpha = jnp.exp(m_prev - m_new)
        prob = jnp.exp(scores - m_new)
        l_ref[...] = alpha * l_ref[...] + jnp.sum(prob, axis=-1, keepdims=True)
        acc_ref[...] = alpha * acc_ref[...] + jnp.dot(
            prob.astype(v.dtype), v, preferred_element_type=jnp.float32)
        m_ref[...] = m_new

    # The mask is only built/applied on tiles that straddle the diagonal; fully
    # visible interior KV tiles take the cheap branch (no iota/compare/select).
    is_diag = (ki * tk + (tk - 1)) > (qi * tq)

    @pl.when(jnp.logical_not(is_diag))
    def _interior():
        _online_softmax_update(s)

    @pl.when(is_diag)
    def _diagonal():
        rows = jax.lax.broadcasted_iota(jnp.int32, (tq, tk), 0)   # q offset in tile
        cols = jax.lax.broadcasted_iota(jnp.int32, (tq, tk), 1)   # k offset in tile
        keep = (qi * tq + rows) >= (ki * tk + cols)                # shared by all groups
        s3 = s.reshape(groups, tq, tk)
        _online_softmax_update(
            jnp.where(keep[None], s3, neg_big).reshape(groups * tq, tk))

    # Finalize at the last KV tile this q tile touches (exact division; runs once).
    last_ki = jnp.minimum(nk - 1, ((qi + 1) * tq - 1) // tk)

    @pl.when(ki == last_ki)
    def _finalize():
        o = acc_ref[...] / l_ref[...]
        o_ref[...] = o.reshape(groups, tq, head_dim).astype(o_ref.dtype)


def pallas_flash_attention(q, k, v, *, tq_target=ATTN_TQ_TARGET,
                           tk_target=ATTN_TK_TARGET):
    """q: (B, H, S, D), k/v: (B, Hkv, S, D) -> (B, H, S, D).  RoPE and the softmax
    scale must already be applied to q/k."""
    B, H, S, D = q.shape
    Hkv = k.shape[1]
    G = H // Hkv
    tq, tk = _fit(S, tq_target), _fit(S, tk_target)
    nq, nk = S // tq, S // tk

    # Compacted causal schedule: only live (qi, ki) pairs, KV-major within each qi.
    qi_list, ki_list = [], []
    for qi in range(nq):
        last = min(nk - 1, ((qi + 1) * tq - 1) // tk)
        for ki in range(last + 1):
            qi_list.append(qi)
            ki_list.append(ki)
    qi_map = jnp.asarray(qi_list, dtype=jnp.int32)
    ki_map = jnp.asarray(ki_list, dtype=jnp.int32)
    n_live = len(qi_list)

    kernel = functools.partial(_flash_attn_kernel, tq=tq, tk=tk, groups=G,
                               head_dim=D, nk=nk)

    return pl.pallas_call(
        kernel,
        out_shape=jax.ShapeDtypeStruct((B, H, S, D), jnp.float32),
        grid_spec=pltpu.PrefetchScalarGridSpec(
            num_scalar_prefetch=2,
            grid=(B, Hkv, n_live),
            in_specs=[
                pl.BlockSpec((None, G, tq, D),                   # q: whole GQA group
                             lambda b, h, p, qi_m, ki_m: (b, h, qi_m[p], 0)),
                pl.BlockSpec((None, None, tk, D),                # k: 1 KV head
                             lambda b, h, p, qi_m, ki_m: (b, h, ki_m[p], 0)),
                pl.BlockSpec((None, None, tk, D),                # v: 1 KV head
                             lambda b, h, p, qi_m, ki_m: (b, h, ki_m[p], 0)),
            ],
            out_specs=pl.BlockSpec((None, G, tq, D),
                                   lambda b, h, p, qi_m, ki_m: (b, h, qi_m[p], 0)),
            scratch_shapes=[
                pltpu.VMEM((G * tq, 1), jnp.float32),            # running max m
                pltpu.VMEM((G * tq, 1), jnp.float32),            # running sum l
                pltpu.VMEM((G * tq, D), jnp.float32),            # fp32 accumulator
            ],
        ),
        compiler_params=pltpu.CompilerParams(
            dimension_semantics=("parallel", "parallel", "arbitrary"),
            vmem_limit_bytes=VMEM_LIMIT_BYTES,
        ),
        cost_estimate=pl.CostEstimate(
            flops=int(2 * B * H * S * S * D),            # causal-halved QK^T + PV
            transcendentals=int(B * H * S * S // 2),
            bytes_accessed=int(q.size * q.dtype.itemsize + k.size * k.dtype.itemsize
                               + v.size * v.dtype.itemsize + B * H * S * D * 4),
        ),
    )(qi_map, ki_map, q, k, v)


# ----------------------------- rotary cache (plain JAX glue) -------------------------
def rotary_cos_sin(seq_len, dim, base=ROPE_THETA):
    inv_freq = 1.0 / (base ** (jnp.arange(0, dim, 2, dtype=jnp.float32) / dim))
    t = jnp.arange(seq_len, dtype=jnp.float32)
    freqs = jnp.outer(t, inv_freq)                   # (S, dim/2)
    emb = jnp.concatenate([freqs, freqs], axis=-1)   # (S, dim)
    return jnp.cos(emb).astype(jnp.float32), jnp.sin(emb).astype(jnp.float32)


# ----------------------------- full module forward -----------------------------------
def qwen2_flash_attention2_forward(hidden_states, params):
    """(B, S, HIDDEN) -> (B, S, HIDDEN); Qwen2FlashAttention2.forward with no KV
    cache / pruning masks / sliding window / dropout (their default inactive state)."""
    B, S, _ = hidden_states.shape
    x2d = hidden_states.reshape(B * S, HIDDEN)

    # Fused QKV projection (weights fused once at parameter-build time).
    qkv = pallas_matmul(x2d, params["wqkv"], params["bqkv"])            # (B*S, q+k+v)
    q_sz = NUM_HEADS * HEAD_DIM
    kv_sz = NUM_KV_HEADS * HEAD_DIM

    q = qkv[:, :q_sz].reshape(B, S, NUM_HEADS, HEAD_DIM).transpose(0, 2, 1, 3)
    k = qkv[:, q_sz:q_sz + kv_sz].reshape(B, S, NUM_KV_HEADS, HEAD_DIM).transpose(0, 2, 1, 3)
    v = qkv[:, q_sz + kv_sz:].reshape(B, S, NUM_KV_HEADS, HEAD_DIM).transpose(0, 2, 1, 3)

    # position_ids = arange(S) for every batch element.
    cos, sin = rotary_cos_sin(S, HEAD_DIM)
    q = pallas_rope(q, cos, sin, scale=1.0 / math.sqrt(HEAD_DIM))       # (B, H, S, D)
    k = pallas_rope(k, cos, sin)                                        # (B, Hkv, S, D)
    v = v.astype(MXU_DTYPE)

    attn = pallas_flash_attention(q, k, v)                              # (B, H, S, D)

    attn = attn.transpose(0, 2, 1, 3).reshape(B * S, NUM_HEADS * HEAD_DIM)
    out = pallas_matmul(attn, params["wo"])                             # o_proj: no bias
    return out.reshape(B, S, HIDDEN)


# ----------------------------- pure-JAX reference ------------------------------------
def reference_forward(hidden_states, params):
    B, S, _ = hidden_states.shape
    x2d = hidden_states.reshape(B * S, HIDDEN)
    q = x2d @ params["wq"] + params["bq"]
    k = x2d @ params["wk"] + params["bk"]
    v = x2d @ params["wv"] + params["bv"]
    q = q.reshape(B, S, NUM_HEADS, HEAD_DIM).transpose(0, 2, 1, 3)
    k = k.reshape(B, S, NUM_KV_HEADS, HEAD_DIM).transpose(0, 2, 1, 3)
    v = v.reshape(B, S, NUM_KV_HEADS, HEAD_DIM).transpose(0, 2, 1, 3)
    cos, sin = rotary_cos_sin(S, HEAD_DIM)

    def rope(x):
        x1 = x[..., : HEAD_DIM // 2]
        x2 = x[..., HEAD_DIM // 2:]
        rot = jnp.concatenate([-x2, x1], axis=-1)
        return x * cos[None, None] + rot * sin[None, None]

    q, k = rope(q), rope(k)
    k = jnp.repeat(k, KV_GROUPS, axis=1)
    v = jnp.repeat(v, KV_GROUPS, axis=1)
    scores = jnp.einsum("bhqd,bhkd->bhqk", q, k) / math.sqrt(HEAD_DIM)
    mask = jnp.tril(jnp.ones((S, S), dtype=bool))
    scores = jnp.where(mask[None, None], scores, jnp.finfo(jnp.float32).min)
    p = jax.nn.softmax(scores.astype(jnp.float32), axis=-1)
    attn = jnp.einsum("bhqk,bhkd->bhqd", p, v)
    attn = attn.transpose(0, 2, 1, 3).reshape(B * S, HIDDEN)
    return (attn @ params["wo"]).reshape(B, S, HIDDEN)


# ----------------------------- params & main ------------------------------------------
def build_params(key):
    ks = jax.random.split(key, 8)
    init = lambda k, shape: (0.02 * jax.random.normal(k, shape)).astype(DTYPE)
    p = {
        "wq": init(ks[0], (HIDDEN, NUM_HEADS * HEAD_DIM)),
        "bq": init(ks[1], (NUM_HEADS * HEAD_DIM,)),
        "wk": init(ks[2], (HIDDEN, NUM_KV_HEADS * HEAD_DIM)),
        "bk": init(ks[3], (NUM_KV_HEADS * HEAD_DIM,)),
        "wv": init(ks[4], (HIDDEN, NUM_KV_HEADS * HEAD_DIM)),
        "bv": init(ks[5], (NUM_KV_HEADS * HEAD_DIM,)),
        "wo": init(ks[6], (NUM_HEADS * HEAD_DIM, HIDDEN)),
    }
    # Fused QKV weight/bias built ONCE here (not per forward call).
    p["wqkv"] = jnp.concatenate([p["wq"], p["wk"], p["wv"]], axis=1)
    p["bqkv"] = jnp.concatenate([p["bq"], p["bk"], p["bv"]], axis=0)
    return p, ks[7]


if __name__ == "__main__":
    key = jax.random.PRNGKey(0)
    params, xkey = build_params(key)
    hidden_states = jax.random.normal(xkey, (BATCH, SEQ, HIDDEN)).astype(DTYPE)

    out = qwen2_flash_attention2_forward(hidden_states, params)
    out = jax.block_until_ready(out)
    assert out.shape == (BATCH, SEQ, HIDDEN)

    ref = reference_forward(hidden_states, params)
    max_err = float(jnp.max(jnp.abs(out - ref)))
    assert jnp.allclose(out, ref, atol=1e-4, rtol=1e-4), f"max_err={max_err}"

    print("KERNEL_OK")
</pallas_src>

<mosaic_0001>
module attributes {stable_mosaic.version = 11 : i64} {
  func.func @_matmul_bias_kernel(%arg0: i32, %arg1: i32, %arg2: i32, %arg3: memref<16x32xf32, #tpu.memory_space<vmem>>, %arg4: memref<32x64xf32, #tpu.memory_space<vmem>>, %arg5: memref<1x64xf32, #tpu.memory_space<vmem>>, %arg6: memref<16x64xf32, #tpu.memory_space<vmem>>) attributes {dimension_semantics = [#tpu.dimension_semantics<parallel>, #tpu.dimension_semantics<parallel>, #tpu.dimension_semantics<arbitrary>], iteration_bounds = array<i64: 1, 1, 1>, scalar_prefetch = 0 : i64, scratch_operands = 0 : i64, tpu.core_type = #tpu.core_type<tc>, window_params = [{transform_indices = @transform_0, window_bounds = array<i64: 16, 32>}, {transform_indices = @transform_1, window_bounds = array<i64: 32, 64>}, {transform_indices = @transform_2, window_bounds = array<i64: 1, 64>}, {transform_indices = @transform_3, window_bounds = array<i64: 16, 64>}]} {
    %c0_i32 = arith.constant 0 : i32
    %0 = arith.cmpi eq, %arg2, %c0_i32 : i32
    %1 = arith.extui %0 : i1 to i32
    %c0_i32_0 = arith.constant 0 : i32
    %2 = arith.cmpi ne, %1, %c0_i32_0 : i32
    scf.if %2 {
      %c0_8 = arith.constant 0 : index
      %c0_9 = arith.constant 0 : index
      %9 = vector.load %arg5[%c0_8, %c0_9] : memref<1x64xf32, #tpu.memory_space<vmem>>, vector<1x64xf32>
      %10 = vector.shape_cast %9 : vector<1x64xf32> to vector<1x64xf32>
      %11 = vector.broadcast %10 : vector<1x64xf32> to vector<16x64xf32>
      %c0_10 = arith.constant 0 : index
      %c0_11 = arith.constant 0 : index
      %12 = vector.load %arg6[%c0_10, %c0_11] : memref<16x64xf32, #tpu.memory_space<vmem>>, vector<16x64xf32>
      tpu.vector_store %arg6[%c0_10, %c0_11], %11 {strides = array<i32>} : memref<16x64xf32, #tpu.memory_space<vmem>>, vector<16x64xf32>,
    } else {
    }
    %c0 = arith.constant 0 : index
    %c0_1 = arith.constant 0 : index
    %3 = vector.load %arg6[%c0, %c0_1] : memref<16x64xf32, #tpu.memory_space<vmem>>, vector<16x64xf32>
    %c0_2 = arith.constant 0 : index
    %c0_3 = arith.constant 0 : index
    %4 = vector.load %arg3[%c0_2, %c0_3] : memref<16x32xf32, #tpu.memory_space<vmem>>, vector<16x32xf32>
    %c0_4 = arith.constant 0 : index
    %c0_5 = arith.constant 0 : index
    %5 = vector.load %arg4[%c0_4, %c0_5] : memref<32x64xf32, #tpu.memory_space<vmem>>, vector<32x64xf32>
    %cst = arith.constant dense<0.000000e+00> : vector<16x64xf32>
    %6 = tpu.matmul %4, %5, %cst {dimension_numbers = #tpu.dot_dimension_numbers<[1], [0], [0], [1], [0, 0, 1, 1], [], []>} : vector<16x32xf32>, vector<32x64xf32>, vector<16x64xf32> -> vector<16x64xf32>
    %7 = arith.addf %3, %6 : vector<16x64xf32>
    %c0_6 = arith.constant 0 : index
    %c0_7 = arith.constant 0 : index
    %8 = vector.load %arg6[%c0_6, %c0_7] : memref<16x64xf32, #tpu.memory_space<vmem>>, vector<16x64xf32>
    tpu.vector_store %arg6[%c0_6, %c0_7], %7 {strides = array<i32>} : memref<16x64xf32, #tpu.memory_space<vmem>>, vector<16x64xf32>,
    return
  }
  func.func @transform_0(%arg0: i32, %arg1: i32, %arg2: i32) -> (i32, i32) {
    %c0_i32 = arith.constant 0 : i32
    return %arg0, %arg2 : i32, i32
  }
  func.func @transform_1(%arg0: i32, %arg1: i32, %arg2: i32) -> (i32, i32) {
    %c0_i32 = arith.constant 0 : i32
    return %arg2, %arg1 : i32, i32
  }
  func.func @transform_2(%arg0: i32, %arg1: i32, %arg2: i32) -> (i32, i32) {
    %c0_i32 = arith.constant 0 : i32
    %c0_i32_0 = arith.constant 0 : i32
    return %c0_i32, %arg1 : i32, i32
  }
  func.func @transform_3(%arg0: i32, %arg1: i32, %arg2: i32) -> (i32, i32) {
    %c0_i32 = arith.constant 0 : i32
    return %arg0, %arg1 : i32, i32
  }
}

</mosaic_0001>

<bundles_post_ra>
// kernel: tpu_custom_call.1
= control target key start
LH: loop header
LB: loop body
LE: loop exit
PB: predicated region body
PF: predicated region fallthrough
CT: control target
= control target key end

     0   :  { %8 = vsyncpa [#allocation3], 0  ;;  %s313_s0 = inlined_call_operand.hbm [shape: f32[16,32], index: 0, kind: input, shape index: {}]   ;;  %s314_s1 = inlined_call_operand.hbm [shape: f32[32,64], index: 1, kind: input, shape index: {}]   ;;  %s315_s2 = inlined_call_operand.vmem [shape: f32[1,64], index: 2, kind: input, shape index: {}]   ;;  %s316_s3 = inlined_call_operand.hbm [shape: f32[16,64], index: 3, kind: output, shape index: {}]  }
   0x1   :  { %9 = vsyncpa [#allocation6], 0 }
   0x2   :  { %10 = vsyncpa [#allocation4], 0  ;;  %s261_s12 = smov [#allocation2]  }
   0x3   :  { %s16_s13 = sshll.u32 %s261_s12, 4  ;;  %s17_s13 = int_to_ptr.vmem [resolvable:$true] %s16_s13 }
   0x4   :  { %s203_s14 = scalar_lea.vmem %s17_s13, 256  ;;  %p208_p1 = scmp.lt.s32.totalorder %s17_s13, %s17_s13 }
   0x5   :  { %p204_p0 = scmp.ne.s32.totalorder %s17_s13, %s203_s14  ;;  %p209_p2 = scmp.lt.s32.totalorder %s203_s14, %s203_s14 }
   0x7   :  { %p210_p3 = por %p209_p2, %p208_p1 }
   0x9   :  { %p211_p4 = pnand %p210_p3, %p204_p0 }
   0xb   :  { %214 = shalt.err (!%p211_p4)
}
   0xc   :  { %s262_s15 = smov 128   ;;  %s263_s16 = smov 8  }
   0xd   :  { %22 = dma.hbm_to_vmem [thread:$0]  %s313_s0, 256, %s17_s13, [#allocation3], %s262_s15, %s262_s15, %s263_s16  }
   0xe   :  { %s264_s19 = smov [#allocation5]  }
   0xf   :  { %s28_s20 = sshll.u32 %s264_s19, 4  ;;  %s29_s20 = int_to_ptr.vmem [resolvable:$true] %s28_s20 }
  0x10   :  { %s223_s21 = scalar_lea.vmem %s29_s20, 512  ;;  %p228_p6 = scmp.lt.s32.totalorder %s29_s20, %s29_s20 }
  0x11   :  { %p224_p5 = scmp.ne.s32.totalorder %s29_s20, %s223_s21  ;;  %p229_p7 = scmp.lt.s32.totalorder %s223_s21, %s223_s21 }
  0x13   :  { %p230_p8 = por %p229_p7, %p228_p6 }
  0x15   :  { %p231_p9 = pnand %p230_p8, %p224_p5 }
  0x17   :  { %234 = shalt.err (!%p231_p9)
}
  0x18   :  { %34 = dma.hbm_to_vmem [thread:$0]  %s314_s1, 512, %s29_s20, [#allocation6], %s262_s15, %s262_s15, %s263_s16  }
  0x19   :  { %255 = dma.done.wait [#allocation3], 256  }
  0x1a   :  { %256 = vsyncadd [#allocation3], 4294967040 }
  0x1b   :  { %257 = dma.done.wait [#allocation6], 512  }
  0x1c   :  { %258 = vsyncadd [#allocation6], 4294966784  ;;  %vm65_vm0 = vcmask 261120   ;;  %v64_v0 = vld [vmem:[#allocation5 + $0x18] sm:$0xff]  ;;  %v63_v1 = vld [vmem:[#allocation5 + $0x10] sm:$0xff]  ;;  %vm54_vm1 = vcmask 523264  }
  0x1d   :  { %179 = vmatprep.subr.mxu0 %v64_v0  ;;  %v59_v2 = vld [vmem:[#allocation2] sm:$0xff]  ;;  %v62_v3 = vld [vmem:[#allocation5 + $0x8] sm:$0xff]  ;;  %v61_v5 = vld [vmem:[#allocation5] sm:$0xff]  ;;  %s265_s1 = smov [#allocation7]  }
  0x1e   :  { %180 = vmatpush3.msra.mxu0 %v64_v0  ;;  %187 = vmatprep.mubr.msk.f32.mxu0 %vm65_vm0, %v59_v2  ;;  %v170_v4 = vld [vmem:[%s315_s2] ss:$0 sm:$0xff]  ;;  %v60_v6 = vld [vmem:[#allocation2 + $0x8] sm:$0xff]  ;;  %s157_s25 = sshll.u32 %s265_s1, 4  ;;  %s158_s25 = int_to_ptr.vmem [resolvable:$true] %s157_s25 }
  0x1f   :  { %181 = vmatprep.subr.mxu0 %v63_v1  ;;  %56 = vst.msk [vmem:[#allocation7 + $0x8] sm:$0xff] %vm54_vm1, %v170_v4  ;;  %55 = vst.msk [vmem:[#allocation7] sm:$0xff] %vm54_vm1, %v170_v4  ;;  %s235_s2 = scalar_lea.vmem %s158_s25, 256  ;;  %p240_p11 = scmp.lt.s32.totalorder %s158_s25, %s158_s25 }
  0x20   :  { %182 = vmatpush3.msra.mxu0 %v63_v1  ;;  %p236_p10 = scmp.ne.s32.totalorder %s158_s25, %s235_s2  ;;  %p241_p12 = scmp.lt.s32.totalorder %s235_s2, %s235_s2 }
  0x21   :  { %183 = vmatprep.subr.mxu0 %v62_v3 }
  0x22   :  { %184 = vmatpush3.msra.mxu0 %v62_v3  ;;  %p242_p13 = por %p241_p12, %p240_p11 }
  0x23   :  { %185 = vmatprep.subr.mxu0 %v61_v5 }
  0x24   :  { %186 = vmatpush3.msra.mxu0 %v61_v5  ;;  %p243_p0 = pnand %p242_p13, %p236_p10 }
  0x25   :  { %188 = vmatmul.mubr.msk.f32.vlgmr.msra.gmra.mxu0 %vm65_vm0, %v60_v6 }
  0x26   :  { %v58_v7 = vld [vmem:[#allocation7 + $0x8] sm:$0xff]  ;;  %v57_v9 = vld [vmem:[#allocation7] sm:$0xff] }
  0xe5   :  { %v189_v8 = vpop.f32.mrf.mxu0 }
  0xe6   :  { %v148_v10 = vadd.f32 %v189_v8, %v58_v7 }
  0xe7   :  { %v138_v11 = vpop.f32.mrf.mxu0 }
  0xe8   :  { %151 = vst.msk [vmem:[#allocation7 + $0x8] sm:$0xff] %vm54_vm1, %v148_v10  ;;  %v147_v12 = vadd.f32 %v138_v11, %v57_v9 }
  0xea   :  { %150 = vst.msk [vmem:[#allocation7] sm:$0xff] %vm54_vm1, %v147_v12 }
  0xeb   :  { %246 = shalt.err (!%p243_p0)
}
  0xec   :  { %163 = dma.vmem_to_hbm [thread:$0]  %s158_s25, 256, %s316_s3, [#allocation4], %s262_s15, %s262_s15, %s263_s16  }
  0xed   :  { %259 = dma.done.wait [#allocation4], 256  }
  0xee   :  { %260 = vsyncadd [#allocation4], 4294967040 }
  0xef   :  { %167 = vsyncpa [#allocation3], 1 }
  0xf0   :  { %168 = vsyncpa [#allocation6], 1 }
  0xf1   :  { %169 = vsyncpa [#allocation4], 1 }

</bundles_post_ra>
